<compile_context>
chip_gen: v5e
topology: v5e:2x2
jax: 0.10.0
libtpu: 0.0.40
codegen_flags: <defaults>
</compile_context>

<pallas_src>
import functools
from typing import NamedTuple

import jax
import jax.numpy as jnp
from jax.experimental import pallas as pl
from jax.experimental.pallas import tpu as pltpu


# ----------------------------------------------------------------------------
# Kernel
# ----------------------------------------------------------------------------
def _flash_attn_kernel(q_ref, k_ref, v_ref,
                       wq_ref, bq_ref, wk_ref, bk_ref, wv_ref, bv_ref,
                       o_ref,
                       q_scr, m_scr, l_scr, acc_scr,
                       *, scale, bf16_exp):
    kv = pl.program_id(2)
    TB, TQ, E = q_ref.shape
    TKV = k_ref.shape[1]
    Dp = wq_ref.shape[1]

    @pl.when(kv == 0)
    def _init():
        # Project the query tile once per (batch, q-tile); fold the 1/sqrt(D)
        # scale into Q here ((TQ,Dp) multiplies instead of (TQ,S) on scores).
        q2 = q_ref[...].reshape(TB * TQ, E).astype(jnp.bfloat16)
        Q = (jnp.dot(q2, wq_ref[...], preferred_element_type=jnp.float32)
             + bq_ref[...])
        q_scr[...] = (Q * scale).astype(jnp.bfloat16).reshape(TB, TQ, Dp)
        m_scr[...] = jnp.full_like(m_scr, -jnp.inf)
        l_scr[...] = jnp.zeros_like(l_scr)
        acc_scr[...] = jnp.zeros_like(acc_scr)

    # Project this KV tile (bf16 MXU inputs, f32 accumulation).
    k2 = k_ref[...].reshape(TB * TKV, E).astype(jnp.bfloat16)
    v2 = v_ref[...].reshape(TB * TKV, E).astype(jnp.bfloat16)
    K = (jnp.dot(k2, wk_ref[...], preferred_element_type=jnp.float32)
         + bk_ref[...]).astype(jnp.bfloat16).reshape(TB, TKV, Dp)
    V = (jnp.dot(v2, wv_ref[...], preferred_element_type=jnp.float32)
         + bv_ref[...]).astype(jnp.bfloat16).reshape(TB, TKV, Dp)

    # Scores for this KV tile (scale already folded into Q).
    # TODO(synk): verify via pl.lower_as_mlir that this einsum does not insert
    #             a per-push XLU relayout of K; if it does, keep K^T in scratch.
    s = jnp.einsum('bqd,bkd->bqk', q_scr[...], K,
                   preferred_element_type=jnp.float32)          # (TB,TQ,TKV) f32

    # Online-softmax update with an unnormalized accumulator (normalization is
    # deferred to the finalize step so no (TQ,TKV) division ever happens).
    m_prev = m_scr[...]
    m_new = jnp.maximum(m_prev, jnp.max(s, axis=-1, keepdims=True))
    alpha = jnp.exp(m_prev - m_new)
    if bf16_exp:
        # v6e/v7x: bf16 EUP path; (s - m_new) <= 0 so exp <= 1 is bf16-safe,
        # and the later cast of p for the PV matmul disappears.
        p = jnp.exp((s - m_new).astype(jnp.bfloat16))
    else:
        # v5e (no bf16 VPU/EUP): keep the exp in f32.
        p = jnp.exp(s - m_new)
    l_scr[...] = alpha * l_scr[...] + jnp.sum(p, axis=-1, keepdims=True,
                                              dtype=jnp.float32)
    acc_scr[...] = alpha * acc_scr[...] + jnp.einsum(
        'bqk,bkd->bqd', p.astype(jnp.bfloat16), V,
        preferred_element_type=jnp.float32)
    m_scr[...] = m_new

    @pl.when(kv == pl.num_programs(2) - 1)
    def _finalize():
        # Deferred softmax normalization: one (TQ,Dp) scale via the EUP vrcp.
        o_ref[...] = (acc_scr[...] *
                      pl.reciprocal(l_scr[...], approx=True)).astype(o_ref.dtype)


# ----------------------------------------------------------------------------
# Generation-aware configuration & tile selection
# ----------------------------------------------------------------------------
class _TpuConfig(NamedTuple):
    vmem_limit_bytes: int
    bf16_exp: bool
    two_tensorcores: bool


def _tpu_config():
    try:
        kind = jax.devices()[0].device_kind.lower()
    except Exception:
        kind = ""
    try:
        phys = int(pltpu.get_tpu_info().vmem_capacity_bytes)
    except Exception:
        phys = 64 << 20  # conservative fallback: v7x-sized VMEM
    is_v7x = ("7x" in kind) or ("tpu7" in kind) or ("v7" in kind)
    bf16_exp = ("v6" in kind) or is_v7x          # v5e/older: no bf16 VPU/EUP
    vmem_limit = max(32 << 20, min(int(phys * 3 // 4), 112 << 20))
    return _TpuConfig(vmem_limit, bf16_exp, is_v7x)


def _work_bytes(TB, TQ, TKV, E, Dp, in_bytes=4, out_bytes=4):
    """Per-grid-step VMEM estimate, including double-buffered pipeline blocks."""
    # Double-buffered pipelined blocks (query + key + value inputs, output).
    pipelined = 2 * (TB * TQ * E * in_bytes
                     + 2 * TB * TKV * E * in_bytes
                     + TB * TQ * Dp * out_bytes)
    # Single-buffered weights / biases (bf16 W, f32 b).
    weights = 3 * (E * Dp * 2 + Dp * 4)
    # Persistent VMEM scratch (bf16 Q, f32 acc, f32 m/l padded to one lane-row).
    scratch = TB * TQ * Dp * (2 + 4) + 2 * TB * TQ * 128 * 4
    # Per-step temporaries: score/p (f32+bf16), projected K/V (f32+bf16), Q f32.
    temps = (TB * TQ * TKV * (4 + 2)
             + 2 * TB * TKV * Dp * (4 + 2)
             + TB * TQ * Dp * 4)
    return pipelined + weights + scratch + temps


def _pick_seq_tile(S, target):
    """Largest multiple-of-8 divisor of S that is <= target, else S itself."""
    best = None
    t = 8
    while t <= min(S, target):
        if S % t == 0:
            best = t
        t += 8
    return best if best is not None else S


def _choose_tiles(B, S, E, Dp, cfg):
    budget = int(cfg.vmem_limit_bytes * 0.7)
    TQ = _pick_seq_tile(S, 256)      # >= 128-row score/PV pushes when possible
    TKV = _pick_seq_tile(S, 512)
    # Shrink seq tiles first if even TB=1 would blow the per-chip budget.
    for _ in range(32):
        if _work_bytes(1, TQ, TKV, E, Dp) <= budget:
            break
        nTKV = _pick_seq_tile(S, max(TKV // 2, 8))
        nTQ = TQ
        if nTKV == TKV:
            nTQ = _pick_seq_tile(S, max(TQ // 2, 8))
        if nTKV == TKV and nTQ == TQ:
            break  # TODO(synk): tile over E as well if this still overflows
        TKV, TQ = nTKV, nTQ

    divisors = [t for t in range(1, B + 1) if B % t == 0]
    feasible = [t for t in divisors if _work_bytes(t, TQ, TKV, E, Dp) <= budget]
    if not feasible:
        return 1, TQ, TKV
    if cfg.two_tensorcores:
        # Keep >= 2 parallel grid blocks so both v7x TensorCores get work; on
        # single-TC v5e/v6e one big block is strictly better (less step overhead).
        par = [t for t in feasible if (B // t) * max(S // TQ, 1) >= 2]
        if par:
            return max(par), TQ, TKV
    return max(feasible), TQ, TKV


# ----------------------------------------------------------------------------
# Wrapper
# ----------------------------------------------------------------------------
def self_attention(query, key, value, wq, bq, wk, bk, wv, bv,
                   attention_head_dim):
    B, S, E = query.shape
    D = attention_head_dim
    scale = 1.0 / (D ** 0.5)

    # Lane-dense output: pad head dim to a multiple of 128 with zero columns.
    # Padded Q/K columns contribute 0 to scores; padded Z columns are exactly 0.
    Dp = ((D + 127) // 128) * 128

    def prep_w(w):   # torch (D, E) layout -> (E, Dp) contraction-major, bf16
        return jnp.pad(w.T, ((0, 0), (0, Dp - D))).astype(jnp.bfloat16)

    def prep_b(b):   # (D,) -> (1, Dp) f32 (added into the f32 accumulator)
        return jnp.pad(b, (0, Dp - D)).astype(jnp.float32).reshape(1, Dp)

    wqT, wkT, wvT = prep_w(wq), prep_w(wk), prep_w(wv)
    bq2, bk2, bv2 = prep_b(bq), prep_b(bk), prep_b(bv)

    cfg = _tpu_config()
    TB, TQ, TKV = _choose_tiles(B, S, E, Dp, cfg)
    grid = (B // TB, S // TQ, S // TKV)

    def const_spec(shape):
        # Constant index_map -> fetched once; single-buffer to return VMEM to
        # the tile budget (matters most under v7x's 64 MiB).
        idx = lambda b, q, k: (0,) * len(shape)
        try:
            return pl.BlockSpec(shape, idx, pipeline_mode=pl.Buffered(1))
        except (TypeError, AttributeError):
            return pl.BlockSpec(shape, idx)

    q_spec = pl.BlockSpec((TB, TQ, E), lambda b, q, k: (b, q, 0))
    kv_spec = pl.BlockSpec((TB, TKV, E), lambda b, q, k: (b, k, 0))
    w_spec = const_spec((E, Dp))
    b_spec = const_spec((1, Dp))
    o_spec = pl.BlockSpec((TB, TQ, Dp), lambda b, q, k: (b, q, 0))

    out = pl.pallas_call(
        functools.partial(_flash_attn_kernel, scale=scale,
                          bf16_exp=cfg.bf16_exp),
        out_shape=jax.ShapeDtypeStruct((B, S, Dp), query.dtype),
        grid_spec=pltpu.PrefetchScalarGridSpec(
            num_scalar_prefetch=0,
            grid=grid,
            in_specs=[q_spec, kv_spec, kv_spec,
                      w_spec, b_spec, w_spec, b_spec, w_spec, b_spec],
            out_specs=o_spec,
            scratch_shapes=[
                pltpu.VMEM((TB, TQ, Dp), jnp.bfloat16),   # scaled Q tile (bf16)
                pltpu.VMEM((TB, TQ, 1), jnp.float32),     # running max m
                pltpu.VMEM((TB, TQ, 1), jnp.float32),     # running denom l
                pltpu.VMEM((TB, TQ, Dp), jnp.float32),    # running numerator
            ]),
        compiler_params=pltpu.CompilerParams(
            dimension_semantics=("parallel", "parallel", "arbitrary"),
            vmem_limit_bytes=cfg.vmem_limit_bytes),
    )(query, key, value, wqT, bq2, wkT, bk2, wvT, bv2)

    # TODO(synk): for D << 128 consumers a padded bf16 slab would halve the
    #             writeback; kept f32 + slice to match the module's semantics.
    return out[:, :, :D]


# ----------------------------------------------------------------------------
# Reference & test
# ----------------------------------------------------------------------------
def _reference(query, key, value, wq, bq, wk, bk, wv, bv, d):
    Q = query @ wq.T + bq
    K = key @ wk.T + bk
    V = value @ wv.T + bv
    score = Q @ jnp.swapaxes(K, -2, -1) / (d ** 0.5)
    attn = jax.nn.softmax(score, axis=-1)
    return attn @ V


if __name__ == "__main__":
    B, S, E, D = 2, 8, 32, 16   # batch, seq, embedding_dim, attention_head_dim

    key0 = jax.random.PRNGKey(0)
    k_q, k_k, k_v, k_wq, k_bq, k_wk, k_bk, k_wv, k_bv = jax.random.split(key0, 9)

    query = jax.random.normal(k_q, (B, S, E), dtype=jnp.float32)
    keyx = jax.random.normal(k_k, (B, S, E), dtype=jnp.float32)
    value = jax.random.normal(k_v, (B, S, E), dtype=jnp.float32)

    # nn.Linear-style init: U(-1/sqrt(E), 1/sqrt(E))
    bound = 1.0 / (E ** 0.5)
    wq = jax.random.uniform(k_wq, (D, E), minval=-bound, maxval=bound, dtype=jnp.float32)
    bq = jax.random.uniform(k_bq, (D,), minval=-bound, maxval=bound, dtype=jnp.float32)
    wk = jax.random.uniform(k_wk, (D, E), minval=-bound, maxval=bound, dtype=jnp.float32)
    bk = jax.random.uniform(k_bk, (D,), minval=-bound, maxval=bound, dtype=jnp.float32)
    wv = jax.random.uniform(k_wv, (D, E), minval=-bound, maxval=bound, dtype=jnp.float32)
    bv = jax.random.uniform(k_bv, (D,), minval=-bound, maxval=bound, dtype=jnp.float32)

    out = self_attention(query, keyx, value, wq, bq, wk, bk, wv, bv, D)
    out = jax.block_until_ready(out)

    ref = _reference(query, keyx, value, wq, bq, wk, bk, wv, bv, D)
    assert out.shape == (B, S, D)
    # Tolerance reflects bf16 MXU inputs (f32 accumulation), optional bf16 exp
    # on v6e/v7x, and the EUP approx reciprocal in the softmax normalization.
    assert jnp.allclose(out, ref, atol=5e-2, rtol=5e-2)

    print("KERNEL_OK")
</pallas_src>

<mosaic_0001>
module attributes {stable_mosaic.version = 11 : i64} {
  func.func @_flash_attn_kernel(%arg0: i32, %arg1: i32, %arg2: i32, %arg3: memref<2x8x32xf32, #tpu.memory_space<vmem>>, %arg4: memref<2x8x32xf32, #tpu.memory_space<vmem>>, %arg5: memref<2x8x32xf32, #tpu.memory_space<vmem>>, %arg6: memref<32x128xbf16, #tpu.memory_space<vmem>>, %arg7: memref<1x128xf32, #tpu.memory_space<vmem>>, %arg8: memref<32x128xbf16, #tpu.memory_space<vmem>>, %arg9: memref<1x128xf32, #tpu.memory_space<vmem>>, %arg10: memref<32x128xbf16, #tpu.memory_space<vmem>>, %arg11: memref<1x128xf32, #tpu.memory_space<vmem>>, %arg12: memref<2x8x128xf32, #tpu.memory_space<vmem>>, %arg13: memref<2x8x128xbf16, #tpu.memory_space<vmem>>, %arg14: memref<2x8x1xf32, #tpu.memory_space<vmem>>, %arg15: memref<2x8x1xf32, #tpu.memory_space<vmem>>, %arg16: memref<2x8x128xf32, #tpu.memory_space<vmem>>) attributes {dimension_semantics = [#tpu.dimension_semantics<parallel>, #tpu.dimension_semantics<parallel>, #tpu.dimension_semantics<arbitrary>], iteration_bounds = array<i64: 1, 1, 1>, scalar_prefetch = 0 : i64, scratch_operands = 4 : i64, tpu.core_type = #tpu.core_type<tc>, window_params = [{transform_indices = @transform_0, window_bounds = array<i64: 2, 8, 32>}, {transform_indices = @transform_1, window_bounds = array<i64: 2, 8, 32>}, {transform_indices = @transform_2, window_bounds = array<i64: 2, 8, 32>}, {pipeline_mode = #tpu.pipeline_mode<synchronous>, transform_indices = @transform_3, window_bounds = array<i64: 32, 128>}, {pipeline_mode = #tpu.pipeline_mode<synchronous>, transform_indices = @transform_4, window_bounds = array<i64: 1, 128>}, {pipeline_mode = #tpu.pipeline_mode<synchronous>, transform_indices = @transform_5, window_bounds = array<i64: 32, 128>}, {pipeline_mode = #tpu.pipeline_mode<synchronous>, transform_indices = @transform_6, window_bounds = array<i64: 1, 128>}, {pipeline_mode = #tpu.pipeline_mode<synchronous>, transform_indices = @transform_7, window_bounds = array<i64: 32, 128>}, {pipeline_mode = #tpu.pipeline_mode<synchronous>, transform_indices = @transform_8, window_bounds = array<i64: 1, 128>}, {transform_indices = @transform_9, window_bounds = array<i64: 2, 8, 128>}]} {
    %c0_i32 = arith.constant 0 : i32
    %0 = arith.cmpi eq, %arg2, %c0_i32 : i32
    %1 = arith.extui %0 : i1 to i32
    %c0_i32_0 = arith.constant 0 : i32
    %2 = arith.cmpi ne, %1, %c0_i32_0 : i32
    scf.if %2 {
      %c0_42 = arith.constant 0 : index
      %c0_43 = arith.constant 0 : index
      %c0_44 = arith.constant 0 : index
      %51 = vector.load %arg3[%c0_42, %c0_43, %c0_44] : memref<2x8x32xf32, #tpu.memory_space<vmem>>, vector<2x8x32xf32>
      %52 = vector.shape_cast %51 : vector<2x8x32xf32> to vector<16x32xf32>
      %53 = arith.truncf %52 : vector<16x32xf32> to vector<16x32xbf16>
      %c0_45 = arith.constant 0 : index
      %c0_46 = arith.constant 0 : index
      %54 = vector.load %arg6[%c0_45, %c0_46] : memref<32x128xbf16, #tpu.memory_space<vmem>>, vector<32x128xbf16>
      %cst_47 = arith.constant dense<0.000000e+00> : vector<16x128xf32>
      %55 = tpu.matmul %53, %54, %cst_47 {dimension_numbers = #tpu.dot_dimension_numbers<[1], [0], [0], [1], [0, 0, 1, 1], [], []>} : vector<16x32xbf16>, vector<32x128xbf16>, vector<16x128xf32> -> vector<16x128xf32>
      %c0_48 = arith.constant 0 : index
      %c0_49 = arith.constant 0 : index
      %56 = vector.load %arg7[%c0_48, %c0_49] : memref<1x128xf32, #tpu.memory_space<vmem>>, vector<1x128xf32>
      %57 = vector.broadcast %56 : vector<1x128xf32> to vector<16x128xf32>
      %58 = arith.addf %55, %57 : vector<16x128xf32>
      %cst_50 = arith.constant 2.500000e-01 : f32
      %59 = vector.broadcast %cst_50 : f32 to vector<16x128xf32>
      %60 = arith.mulf %58, %59 : vector<16x128xf32>
      %61 = arith.truncf %60 : vector<16x128xf32> to vector<16x128xbf16>
      %62 = vector.shape_cast %61 : vector<16x128xbf16> to vector<2x8x128xbf16>
      %c0_51 = arith.constant 0 : index
      %c0_52 = arith.constant 0 : index
      %c0_53 = arith.constant 0 : index
      %63 = vector.load %arg13[%c0_51, %c0_52, %c0_53] : memref<2x8x128xbf16, #tpu.memory_space<vmem>>, vector<2x8x128xbf16>
      tpu.vector_store %arg13[%c0_51, %c0_52, %c0_53], %62 {strides = array<i32>} : memref<2x8x128xbf16, #tpu.memory_space<vmem>>, vector<2x8x128xbf16>,
      %cst_54 = arith.constant 0xFF800000 : f32
      %64 = vector.broadcast %cst_54 : f32 to vector<2x8x1xf32>
      %c0_55 = arith.constant 0 : index
      %c0_56 = arith.constant 0 : index
      %c0_57 = arith.constant 0 : index
      %65 = vector.load %arg14[%c0_55, %c0_56, %c0_57] : memref<2x8x1xf32, #tpu.memory_space<vmem>>, vector<2x8x1xf32>
      tpu.vector_store %arg14[%c0_55, %c0_56, %c0_57], %64 {strides = array<i32>} : memref<2x8x1xf32, #tpu.memory_space<vmem>>, vector<2x8x1xf32>,
      %cst_58 = arith.constant 0.000000e+00 : f32
      %66 = vector.broadcast %cst_58 : f32 to vector<2x8x1xf32>
      %c0_59 = arith.constant 0 : index
      %c0_60 = arith.constant 0 : index
      %c0_61 = arith.constant 0 : index
      %67 = vector.load %arg15[%c0_59, %c0_60, %c0_61] : memref<2x8x1xf32, #tpu.memory_space<vmem>>, vector<2x8x1xf32>
      tpu.vector_store %arg15[%c0_59, %c0_60, %c0_61], %66 {strides = array<i32>} : memref<2x8x1xf32, #tpu.memory_space<vmem>>, vector<2x8x1xf32>,
      %cst_62 = arith.constant 0.000000e+00 : f32
      %68 = vector.broadcast %cst_62 : f32 to vector<2x8x128xf32>
      %c0_63 = arith.constant 0 : index
      %c0_64 = arith.constant 0 : index
      %c0_65 = arith.constant 0 : index
      %69 = vector.load %arg16[%c0_63, %c0_64, %c0_65] : memref<2x8x128xf32, #tpu.memory_space<vmem>>, vector<2x8x128xf32>
      tpu.vector_store %arg16[%c0_63, %c0_64, %c0_65], %68 {strides = array<i32>} : memref<2x8x128xf32, #tpu.memory_space<vmem>>, vector<2x8x128xf32>,
    } else {
    }
    %c0 = arith.constant 0 : index
    %c0_1 = arith.constant 0 : index
    %c0_2 = arith.constant 0 : index
    %3 = vector.load %arg4[%c0, %c0_1, %c0_2] : memref<2x8x32xf32, #tpu.memory_space<vmem>>, vector<2x8x32xf32>
    %4 = vector.shape_cast %3 : vector<2x8x32xf32> to vector<16x32xf32>
    %5 = arith.truncf %4 : vector<16x32xf32> to vector<16x32xbf16>
    %c0_3 = arith.constant 0 : index
    %c0_4 = arith.constant 0 : index
    %c0_5 = arith.constant 0 : index
    %6 = vector.load %arg5[%c0_3, %c0_4, %c0_5] : memref<2x8x32xf32, #tpu.memory_space<vmem>>, vector<2x8x32xf32>
    %7 = vector.shape_cast %6 : vector<2x8x32xf32> to vector<16x32xf32>
    %8 = arith.truncf %7 : vector<16x32xf32> to vector<16x32xbf16>
    %c0_6 = arith.constant 0 : index
    %c0_7 = arith.constant 0 : index
    %9 = vector.load %arg8[%c0_6, %c0_7] : memref<32x128xbf16, #tpu.memory_space<vmem>>, vector<32x128xbf16>
    %cst = arith.constant dense<0.000000e+00> : vector<16x128xf32>
    %10 = tpu.matmul %5, %9, %cst {dimension_numbers = #tpu.dot_dimension_numbers<[1], [0], [0], [1], [0, 0, 1, 1], [], []>} : vector<16x32xbf16>, vector<32x128xbf16>, vector<16x128xf32> -> vector<16x128xf32>
    %c0_8 = arith.constant 0 : index
    %c0_9 = arith.constant 0 : index
    %11 = vector.load %arg9[%c0_8, %c0_9] : memref<1x128xf32, #tpu.memory_space<vmem>>, vector<1x128xf32>
    %12 = vector.broadcast %11 : vector<1x128xf32> to vector<16x128xf32>
    %13 = arith.addf %10, %12 : vector<16x128xf32>
    %14 = arith.truncf %13 : vector<16x128xf32> to vector<16x128xbf16>
    %15 = vector.shape_cast %14 : vector<16x128xbf16> to vector<2x8x128xbf16>
    %c0_10 = arith.constant 0 : index
    %c0_11 = arith.constant 0 : index
    %16 = vector.load %arg10[%c0_10, %c0_11] : memref<32x128xbf16, #tpu.memory_space<vmem>>, vector<32x128xbf16>
    %cst_12 = arith.constant dense<0.000000e+00> : vector<16x128xf32>
    %17 = tpu.matmul %8, %16, %cst_12 {dimension_numbers = #tpu.dot_dimension_numbers<[1], [0], [0], [1], [0, 0, 1, 1], [], []>} : vector<16x32xbf16>, vector<32x128xbf16>, vector<16x128xf32> -> vector<16x128xf32>
    %c0_13 = arith.constant 0 : index
    %c0_14 = arith.constant 0 : index
    %18 = vector.load %arg11[%c0_13, %c0_14] : memref<1x128xf32, #tpu.memory_space<vmem>>, vector<1x128xf32>
    %19 = vector.broadcast %18 : vector<1x128xf32> to vector<16x128xf32>
    %20 = arith.addf %17, %19 : vector<16x128xf32>
    %21 = arith.truncf %20 : vector<16x128xf32> to vector<16x128xbf16>
    %22 = vector.shape_cast %21 : vector<16x128xbf16> to vector<2x8x128xbf16>
    %c0_15 = arith.constant 0 : index
    %c0_16 = arith.constant 0 : index
    %c0_17 = arith.constant 0 : index
    %23 = vector.load %arg13[%c0_15, %c0_16, %c0_17] : memref<2x8x128xbf16, #tpu.memory_space<vmem>>, vector<2x8x128xbf16>
    "tpu.trace_start"() <{level = 10 : i32, message = "bqd,bkd->bqk"}> : () -> ()
    %cst_18 = arith.constant dense<0.000000e+00> : vector<2x8x8xf32>
    %24 = tpu.matmul %23, %15, %cst_18 {dimension_numbers = #tpu.dot_dimension_numbers<[2], [2], [1], [1], [0, 0, 0, 1, 1, 1], [0], [0]>} : vector<2x8x128xbf16>, vector<2x8x128xbf16>, vector<2x8x8xf32> -> vector<2x8x8xf32>
    "tpu.trace_stop"() : () -> ()
    %c0_19 = arith.constant 0 : index
    %c0_20 = arith.constant 0 : index
    %c0_21 = arith.constant 0 : index
    %25 = vector.load %arg14[%c0_19, %c0_20, %c0_21] : memref<2x8x1xf32, #tpu.memory_space<vmem>>, vector<2x8x1xf32>
    %cst_22 = arith.constant dense<0xFF800000> : vector<2x8xf32>
    %26 = vector.multi_reduction <maximumf>, %24, %cst_22 [2] : vector<2x8x8xf32> to vector<2x8xf32>
    %27 = vector.shape_cast %26 : vector<2x8xf32> to vector<2x8x1xf32>
    %28 = arith.maximumf %25, %27 : vector<2x8x1xf32>
    %29 = arith.subf %25, %28 : vector<2x8x1xf32>
    %30 = math.exp %29 : vector<2x8x1xf32>
    %31 = vector.broadcast %28 : vector<2x8x1xf32> to vector<2x8x8xf32>
    %32 = arith.subf %24, %31 : vector<2x8x8xf32>
    %33 = math.exp %32 : vector<2x8x8xf32>
    %c0_23 = arith.constant 0 : index
    %c0_24 = arith.constant 0 : index
    %c0_25 = arith.constant 0 : index
    %34 = vector.load %arg15[%c0_23, %c0_24, %c0_25] : memref<2x8x1xf32, #tpu.memory_space<vmem>>, vector<2x8x1xf32>
    %35 = arith.mulf %30, %34 : vector<2x8x1xf32>
    %cst_26 = arith.constant dense<0.000000e+00> : vector<2x8xf32>
    %36 = vector.multi_reduction <add>, %33, %cst_26 [2] : vector<2x8x8xf32> to vector<2x8xf32>
    %37 = vector.shape_cast %36 : vector<2x8xf32> to vector<2x8x1xf32>
    %38 = arith.addf %35, %37 : vector<2x8x1xf32>
    %c0_27 = arith.constant 0 : index
    %c0_28 = arith.constant 0 : index
    %c0_29 = arith.constant 0 : index
    %39 = vector.load %arg15[%c0_27, %c0_28, %c0_29] : memref<2x8x1xf32, #tpu.memory_space<vmem>>, vector<2x8x1xf32>
    tpu.vector_store %arg15[%c0_27, %c0_28, %c0_29], %38 {strides = array<i32>} : memref<2x8x1xf32, #tpu.memory_space<vmem>>, vector<2x8x1xf32>,
    %c0_30 = arith.constant 0 : index
    %c0_31 = arith.constant 0 : index
    %c0_32 = arith.constant 0 : index
    %40 = vector.load %arg16[%c0_30, %c0_31, %c0_32] : memref<2x8x128xf32, #tpu.memory_space<vmem>>, vector<2x8x128xf32>
    %41 = vector.broadcast %30 : vector<2x8x1xf32> to vector<2x8x128xf32>
    %42 = arith.mulf %41, %40 : vector<2x8x128xf32>
    %43 = arith.truncf %33 : vector<2x8x8xf32> to vector<2x8x8xbf16>
    "tpu.trace_start"() <{level = 10 : i32, message = "bqk,bkd->bqd"}> : () -> ()
    %cst_33 = arith.constant dense<0.000000e+00> : vector<2x8x128xf32>
    %44 = tpu.matmul %43, %22, %cst_33 {dimension_numbers = #tpu.dot_dimension_numbers<[2], [1], [1], [2], [0, 0, 0, 1, 1, 2], [0], [0]>} : vector<2x8x8xbf16>, vector<2x8x128xbf16>, vector<2x8x128xf32> -> vector<2x8x128xf32>
    "tpu.trace_stop"() : () -> ()
    %45 = arith.addf %42, %44 : vector<2x8x128xf32>
    %c0_34 = arith.constant 0 : index
    %c0_35 = arith.constant 0 : index
    %c0_36 = arith.constant 0 : index
    %46 = vector.load %arg16[%c0_34, %c0_35, %c0_36] : memref<2x8x128xf32, #tpu.memory_space<vmem>>, vector<2x8x128xf32>
    tpu.vector_store %arg16[%c0_34, %c0_35, %c0_36], %45 {strides = array<i32>} : memref<2x8x128xf32, #tpu.memory_space<vmem>>, vector<2x8x128xf32>,
    %c0_37 = arith.constant 0 : index
    %c0_38 = arith.constant 0 : index
    %c0_39 = arith.constant 0 : index
    %47 = vector.load %arg14[%c0_37, %c0_38, %c0_39] : memref<2x8x1xf32, #tpu.memory_space<vmem>>, vector<2x8x1xf32>
    tpu.vector_store %arg14[%c0_37, %c0_38, %c0_39], %28 {strides = array<i32>} : memref<2x8x1xf32, #tpu.memory_space<vmem>>, vector<2x8x1xf32>,
    %c0_i32_40 = arith.constant 0 : i32
    %48 = arith.cmpi eq, %arg2, %c0_i32_40 : i32
    %49 = arith.extui %48 : i1 to i32
    %c0_i32_41 = arith.constant 0 : i32
    %50 = arith.cmpi ne, %49, %c0_i32_41 : i32
    scf.if %50 {
      %c0_42 = arith.constant 0 : index
      %c0_43 = arith.constant 0 : index
      %c0_44 = arith.constant 0 : index
      %51 = vector.load %arg16[%c0_42, %c0_43, %c0_44] : memref<2x8x128xf32, #tpu.memory_space<vmem>>, vector<2x8x128xf32>
      %c0_45 = arith.constant 0 : index
      %c0_46 = arith.constant 0 : index
      %c0_47 = arith.constant 0 : index
      %52 = vector.load %arg15[%c0_45, %c0_46, %c0_47] : memref<2x8x1xf32, #tpu.memory_space<vmem>>, vector<2x8x1xf32>
      %53 = tpu.reciprocal %52 {approx = true} : vector<2x8x1xf32> -> vector<2x8x1xf32>
      %54 = vector.broadcast %53 : vector<2x8x1xf32> to vector<2x8x128xf32>
      %55 = arith.mulf %51, %54 : vector<2x8x128xf32>
      %c0_48 = arith.constant 0 : index
      %c0_49 = arith.constant 0 : index
      %c0_50 = arith.constant 0 : index
      %56 = vector.load %arg12[%c0_48, %c0_49, %c0_50] : memref<2x8x128xf32, #tpu.memory_space<vmem>>, vector<2x8x128xf32>
      tpu.vector_store %arg12[%c0_48, %c0_49, %c0_50], %55 {strides = array<i32>} : memref<2x8x128xf32, #tpu.memory_space<vmem>>, vector<2x8x128xf32>,
    } else {
    }
    return
  }
  func.func @transform_0(%arg0: i32, %arg1: i32, %arg2: i32) -> (i32, i32, i32) {
    %c0_i32 = arith.constant 0 : i32
    %c0_i32_0 = arith.constant 0 : i32
    return %arg0, %arg1, %c0_i32 : i32, i32, i32
  }
  func.func @transform_1(%arg0: i32, %arg1: i32, %arg2: i32) -> (i32, i32, i32) {
    %c0_i32 = arith.constant 0 : i32
    %c0_i32_0 = arith.constant 0 : i32
    return %arg0, %arg2, %c0_i32 : i32, i32, i32
  }
  func.func @transform_2(%arg0: i32, %arg1: i32, %arg2: i32) -> (i32, i32, i32) {
    %c0_i32 = arith.constant 0 : i32
    %c0_i32_0 = arith.constant 0 : i32
    return %arg0, %arg2, %c0_i32 : i32, i32, i32
  }
  func.func @transform_3(%arg0: i32, %arg1: i32, %arg2: i32) -> (i32, i32) {
    %c0_i32 = arith.constant 0 : i32
    %c0_i32_0 = arith.constant 0 : i32
    %c0_i32_1 = arith.constant 0 : i32
    return %c0_i32, %c0_i32_0 : i32, i32
  }
  func.func @transform_4(%arg0: i32, %arg1: i32, %arg2: i32) -> (i32, i32) {
    %c0_i32 = arith.constant 0 : i32
    %c0_i32_0 = arith.constant 0 : i32
    %c0_i32_1 = arith.constant 0 : i32
    return %c0_i32, %c0_i32_0 : i32, i32
  }
  func.func @transform_5(%arg0: i32, %arg1: i32, %arg2: i32) -> (i32, i32) {
    %c0_i32 = arith.constant 0 : i32
    %c0_i32_0 = arith.constant 0 : i32
    %c0_i32_1 = arith.constant 0 : i32
    return %c0_i32, %c0_i32_0 : i32, i32
  }
  func.func @transform_6(%arg0: i32, %arg1: i32, %arg2: i32) -> (i32, i32) {
    %c0_i32 = arith.constant 0 : i32
    %c0_i32_0 = arith.constant 0 : i32
    %c0_i32_1 = arith.constant 0 : i32
    return %c0_i32, %c0_i32_0 : i32, i32
  }
  func.func @transform_7(%arg0: i32, %arg1: i32, %arg2: i32) -> (i32, i32) {
    %c0_i32 = arith.constant 0 : i32
    %c0_i32_0 = arith.constant 0 : i32
    %c0_i32_1 = arith.constant 0 : i32
    return %c0_i32, %c0_i32_0 : i32, i32
  }
  func.func @transform_8(%arg0: i32, %arg1: i32, %arg2: i32) -> (i32, i32) {
    %c0_i32 = arith.constant 0 : i32
    %c0_i32_0 = arith.constant 0 : i32
    %c0_i32_1 = arith.constant 0 : i32
    return %c0_i32, %c0_i32_0 : i32, i32
  }
  func.func @transform_9(%arg0: i32, %arg1: i32, %arg2: i32) -> (i32, i32, i32) {
    %c0_i32 = arith.constant 0 : i32
    %c0_i32_0 = arith.constant 0 : i32
    return %arg0, %arg1, %c0_i32 : i32, i32, i32
  }
}

</mosaic_0001>

<bundles_post_ra>
// kernel: tpu_custom_call.1
= control target key start
LH: loop header
LB: loop body
LE: loop exit
PB: predicated region body
PF: predicated region fallthrough
CT: control target
= control target key end

     0   :  { %14 = vsyncpa [#allocation7], 0  ;;  %s826_s0 = inlined_call_operand.hbm [shape: f32[2,8,32], index: 0, kind: input, shape index: {}]   ;;  %s827_s1 = inlined_call_operand.hbm [shape: f32[2,8,32], index: 1, kind: input, shape index: {}]   ;;  %s828_s2 = inlined_call_operand.hbm [shape: f32[2,8,32], index: 2, kind: input, shape index: {}]   ;;  %s829_s3 = inlined_call_operand.hbm [shape: bf16[32,128], index: 3, kind: input, shape index: {}]   ;;  %s830_s4 = inlined_call_operand.vmem [shape: f32[1,128], index: 4, kind: input, shape index: {}]   ;;  %s831_s5 = inlined_call_operand.hbm [shape: bf16[32,128], index: 5, kind: input, shape index: {}]   ;;  %s832_s6 = inlined_call_operand.vmem [shape: f32[1,128], index: 6, kind: input, shape index: {}]   ;;  %s833_s7 = inlined_call_operand.hbm [shape: bf16[32,128], index: 7, kind: input, shape index: {}]   ;;  %s834_s8 = inlined_call_operand.vmem [shape: f32[1,128], index: 8, kind: input, shape index: {}]   ;;  %s835_s9 = inlined_call_operand.hbm [shape: f32[2,8,128], index: 9, kind: output, shape index: {}]  }
   0x1   :  { %15 = vsyncpa [#allocation10], 0 }
   0x2   :  { %16 = vsyncpa [#allocation13], 0 }
   0x3   :  { %17 = vsyncpa [#allocation16], 0 }
   0x4   :  { %18 = vsyncpa [#allocation8], 0  ;;  %s36_s11 = sshll.u32 %s827_s1, 4  ;;  %s703_s12 = smov [#allocation9]   ;;  %s37_s11 = int_to_ptr.hbm [resolvable:$true] %s36_s11 }
   0x5   :  { %s38_s13 = sshll.u32 %s703_s12, 4  ;;  %s62_s16 = sshll.u32 %s829_s3, 4  ;;  %s39_s13 = int_to_ptr.vmem [resolvable:$true] %s38_s13  ;;  %s63_s16 = int_to_ptr.hbm [resolvable:$true] %s62_s16 }
   0x6   :  { %s704_s17 = smov 128   ;;  %s705_s18 = smov 8  }
   0x7   :  { %44 = dma.hbm_to_vmem [thread:$0]  %s37_s11, 256, %s39_s13, [#allocation10], %s704_s17, %s704_s17, %s705_s18  }
   0x8   :  { %s706_s19 = smov [#allocation12]   ;;  %s707_s21 = smov 64  }
   0x9   :  { %s64_s20 = sshll.u32 %s706_s19, 4  ;;  %s708_s1 = smov 4   ;;  %s65_s20 = int_to_ptr.vmem [resolvable:$true] %s64_s20 }
   0xa   :  { %70 = dma.hbm_to_vmem [thread:$0]  %s63_s16, 256, %s65_s20, [#allocation13], %s707_s21, %s707_s21, %s708_s1  }
   0xb   :  { %s23_s24 = sshll.u32 %s826_s0, 4  ;;  %s709_s25 = smov [#allocation6]   ;;  %s24_s24 = int_to_ptr.hbm [resolvable:$true] %s23_s24 }
   0xc   :  { %s25_s3 = sshll.u32 %s709_s25, 4  ;;  %s49_s28 = sshll.u32 %s828_s2, 4  ;;  %s26_s3 = int_to_ptr.vmem [resolvable:$true] %s25_s3  ;;  %s50_s28 = int_to_ptr.hbm [resolvable:$true] %s49_s28 }
   0xd   :  { %31 = dma.hbm_to_vmem [thread:$0]  %s24_s24, 256, %s26_s3, [#allocation7], %s704_s17, %s704_s17, %s705_s18  }
   0xe   :  { %s710_s29 = smov [#allocation11]   ;;  %s77_s12 = sshll.u32 %s831_s5, 4  ;;  %s78_s12 = int_to_ptr.hbm [resolvable:$true] %s77_s12 }
   0xf   :  { %s51_s30 = sshll.u32 %s710_s29, 4  ;;  %s92_s2 = sshll.u32 %s833_s7, 4  ;;  %s52_s30 = int_to_ptr.vmem [resolvable:$true] %s51_s30  ;;  %s93_s2 = int_to_ptr.hbm [resolvable:$true] %s92_s2 }
  0x10   :  { %57 = dma.hbm_to_vmem [thread:$0]  %s50_s28, 256, %s52_s30, [#allocation10], %s704_s17, %s704_s17, %s705_s18  }
  0x11   :  { %s711_s14 = smov [#allocation14]   ;;  %s712_s16 = smov [#allocation15]  }
  0x12   :  { %s79_s15 = sshll.u32 %s711_s14, 4  ;;  %s94_s19 = sshll.u32 %s712_s16, 4  ;;  %s80_s15 = int_to_ptr.vmem [resolvable:$true] %s79_s15  ;;  %s95_s19 = int_to_ptr.vmem [resolvable:$true] %s94_s19 }
  0x13   :  { %85 = dma.hbm_to_vmem [thread:$0]  %s78_s12, 256, %s80_s15, [#allocation13], %s707_s21, %s707_s21, %s708_s1  }
  0x14   :  { %100 = dma.hbm_to_vmem [thread:$0]  %s93_s2, 256, %s95_s19, [#allocation16], %s707_s21, %s707_s21, %s708_s1  }
  0x15   :  { %693 = dma.done.wait [#allocation7], 256  }
  0x16   :  { %694 = vsyncadd [#allocation7], 4294967040 }
  0x17   :  { %695 = dma.done.wait [#allocation10], 512  }
  0x18   :  { %696 = vsyncadd [#allocation10], 4294966784 }
  0x19   :  { %697 = dma.done.wait [#allocation13], 512  }
  0x1a   :  { %698 = vsyncadd [#allocation13], 4294966784 }
  0x1b   :  { %699 = dma.done.wait [#allocation16], 256  }
  0x1c   :  { %700 = vsyncadd [#allocation16], 4294967040  ;;  %v483_v0 = vld [vmem:[#allocation12 + $0x8] sm:$0xff]  ;;  %v485_v1 = vld [vmem:[#allocation14 + $0x8] sm:$0xff]  ;;  %vm155_vm0 = vcmask 261120   ;;  %vm179_vm1 = vcmask 7168  }
  0x1d   :  { %v482_v2 = vld [vmem:[#allocation12] sm:$0xff]  ;;  %v484_v3 = vld [vmem:[#allocation14] sm:$0xff]  ;;  %v133_v5 = vld [vmem:[#allocation6 + $0x8] sm:$0xff]  ;;  %165 = vmatpush.bf16.msra.mxu0 %v483_v0  ;;  %222 = vmatpush.bf16.msra.mxu1 %v485_v1  ;;  %v713_v28 = vmov -inf   ;;  %vm301_vm2 = vcmask 64512   ;;  %v714_v39 = vmov 0  }
  0x1e   :  { %v132_v4 = vld [vmem:[#allocation6] sm:$0xff]  ;;  %v186_v6 = vld [vmem:[#allocation9] sm:$0xff]  ;;  %v187_v7 = vld [vmem:[#allocation9 + $0x8] sm:$0xff]  ;;  %181 = vst.msk [vmem:[#allocation3 + $0x8] sm:$0xff] %vm179_vm1, %v713_v28  ;;  %507 = vset.pattern.permute.xlu1 %v714_v39  ;;  %508 = vset.pattern.permute.xlu0 %v714_v39  ;;  %v715_v40 = vmov 0.0   ;;  %vm366_vm3 = vcmask 1043456  }
  0x1f   :  { %v134_v8 = vpack.c.bf16 %v133_v5, %v132_v4  ;;  %v188_v9 = vpack.c.bf16 %v187_v7, %v186_v6  ;;  %v511_v10 = vld [vmem:[%s832_s6] ss:$0 sm:$0xff]  ;;  %v486_v29 = vld [vmem:[#allocation15] sm:$0xff]  ;;  %v189_v30 = vld [vmem:[#allocation11] sm:$0xff]  ;;  %180 = vst.msk [vmem:[#allocation3] sm:$0xff] %vm179_vm1, %v713_v28  ;;  %509 = vset.pattern.permute.xlu2 %v714_v39  ;;  %s437_s24 = sshll.u32 %s835_s9, 4  ;;  %s438_s24 = int_to_ptr.hbm [resolvable:$true] %s437_s24 }
  0x20   :  { %v510_v14 = vld [vmem:[%s830_s4] ss:$0 sm:$0xff]  ;;  %v190_v31 = vld [vmem:[#allocation11 + $0x8] sm:$0xff]  ;;  %182 = vst.msk [vmem:[#allocation4] sm:$0xff] %vm179_vm1, %v715_v40 }
  0x21   :  { %166 = vmatpush.bf16.msra.mxu0 %v482_v2  ;;  %223 = vmatpush.bf16.msra.mxu1 %v484_v3  ;;  %v487_v27 = vld [vmem:[#allocation15 + $0x8] sm:$0xff]  ;;  %v191_v32 = vpack.c.bf16 %v190_v31, %v189_v30  ;;  %183 = vst.msk [vmem:[#allocation4 + $0x8] sm:$0xff] %vm179_vm1, %v715_v40 }
  0x22   :  { %261 = vmatpush.bf16.msra.mxu2 %v487_v27  ;;  %v512_v54 = vld [vmem:[%s834_s8] ss:$0 sm:$0xff]  ;;  %s716_s8 = smov [#allocation17]  }
  0x23   :  { %s435_s1 = sshll.u32 %s716_s8, 4  ;;  %s436_s1 = int_to_ptr.vmem [resolvable:$true] %s435_s1 }
  0x24   :  { %461 = vmatmul.msk.bf16.vlgmr.msra.gmra.mxu0 %vm155_vm0, %v134_v8  ;;  %470 = vmatmul.msk.bf16.vlgmr.msra.gmra.mxu1 %vm155_vm0, %v188_v9 }
  0x25   :  { %v300_v41 = vld [vmem:[#allocation3 + $0x8] sm:$0xff] }
  0x26   :  { %262 = vmatpush.bf16.msra.mxu2 %v486_v29  ;;  %v299_v45 = vld [vmem:[#allocation3] sm:$0xff] }
  0x29   :  { %479 = vmatmul.msk.bf16.vlgmr.msra.gmra.mxu2 %vm155_vm0, %v191_v32 }
  0xa1   :  { %v168_v11 = vpop.f32.mrf.mxu0  ;;  %v225_v12 = vpop.f32.mrf.mxu1 }
  0xa2   :  { %v226_v13 = vadd.f32 %v511_v10, %v225_v12  ;;  %v169_v16 = vadd.f32 %v510_v14, %v168_v11 }
  0xa4   :  { %v230_v15 = vpack.c.bf16 %v226_v13, %v226_v13  ;;  %v173_v21 = vmul.f32 0.25, %v169_v16 }
  0xa6   :  { %280 = vmatpush.bf16.xpose.msra.mxu3 %v230_v15 }
  0xa9   :  { %v170_v17 = vpop.f32.mrf.mxu0  ;;  %v227_v18 = vpop.f32.mrf.mxu1 }
  0xaa   :  { %v171_v19 = vadd.f32 %v510_v14, %v170_v17  ;;  %v228_v20 = vadd.f32 %v511_v10, %v227_v18  ;;  %v332_v10 = vld [vmem:[#allocation4] sm:$0xff]  ;;  %v333_v14 = vld [vmem:[#allocation4 + $0x8] sm:$0xff] }
  0xac   :  { %v174_v22 = vmul.f32 0.25, %v171_v19  ;;  %v231_v23 = vpack.c.bf16 %v228_v20, %v228_v20  ;;  %v264_v53 = vpop.f32.mrf.mxu2 }
  0xad   :  { %v265_v58 = vadd.f32 %v512_v54, %v264_v53 }
  0xae   :  { %v491_v24 = vpack.c.bf16 %v174_v22, %v173_v21  ;;  %293 = vmatpush.bf16.xpose.msrb.mxu0 %v231_v23 }
  0xaf   :  { %v269_v60 = vpack.c.bf16 %v265_v58, %v265_v58 }
  0xb0   :  { %492 = vst [vmem:[#allocation2] sm:$0xff] %v491_v24  }
  0xb1   :  { %v368_v61 = vsel %vm366_vm3, %v269_v60, 0 }
  0xb2   :  { %377 = vmatpush.bf16.msrb.mxu1 %v368_v61 }
  0xb4   :  { %v266_v55 = vpop.f32.mrf.mxu2 }
  0xb5   :  { %v267_v56 = vadd.f32 %v512_v54, %v266_v55 }
  0xb7   :  { %v271_v25 = vld [vmem:[#allocation2] sm:$0xf]  ;;  %v272_v26 = vld [vmem:[#allocation2 + $0x4] sm:$0xf]  ;;  %v270_v57 = vpack.c.bf16 %v267_v56, %v267_v56 }
  0xb8   :  { %281 = vmatmul.bf16.vlgmr.msra.gmra.mxu3 %v271_v25  ;;  %294 = vmatmul.bf16.vlgmr.msrb.gmra.mxu0 %v272_v26 }
  0xb9   :  { %v387_v59 = vsel %vm366_vm3, %v270_v57, 0 }
  0xba   :  { %396 = vmatpush.bf16.msrb.mxu2 %v387_v59 }
 0x135   :  { %v295_v33 = vpop.f32.mrf.mxu0 }
 0x136   :  { %v305_v34 = vsel %vm301_vm2, %v295_v33, -inf }
 0x137   :  { %306 = vmax.xlane.f32.xlu0 %v305_v34 }
 0x13b   :  { %v282_v35 = vpop.f32.mrf.mxu3 }
 0x13c   :  { %v302_v37 = vsel %vm301_vm2, %v282_v35, -inf }
 0x13d   :  { %v297_v36 = vpop.f32.mrf.mxu0 }
 0x13f   :  { %303 = vmax.xlane.f32.xlu0 %v302_v37 }
 0x143   :  { %v284_v38 = vpop.f32.mrf.mxu3 }
 0x1aa   :  { %v307_v42 = vpop.xlane.xlu0 %306 }
 0x1ab   :  { %v309_v43 = vmax.f32 %v300_v41, %v307_v42 }
 0x1ad   :  { %407 = vst.msk [vmem:[#allocation3 + $0x8] sm:$0xff] %vm179_vm1, %v309_v43  ;;  %323 = vperm.xlu1 %507, %v309_v43   ;;  %v311_v44 = vsub.f32 %v300_v41, %v309_v43 }
 0x1af   :  { %v314_v46 = vmul.f32 1.442695, %v311_v44 }
 0x1b1   :  { %513 = vpow2.f32 %v314_v46 }
 0x1b2   :  { %v304_v47 = vpop.xlane.xlu0 %303 }
 0x1b3   :  { %v308_v48 = vmax.f32 %v299_v45, %v304_v47 }
 0x1b5   :  { %v310_v49 = vsub.f32 %v299_v45, %v308_v48  ;;  %406 = vst.msk [vmem:[#allocation3] sm:$0xff] %vm179_vm1, %v308_v48  ;;  %318 = vperm.xlu1 %507, %v308_v48  }
 0x1b7   :  { %v312_v50 = vmul.f32 1.442695, %v310_v49  ;;  %v514_v51 = vpop.eup %513 }
 0x1b8   :  { %v335_v15 = vmul.f32 %v514_v51, %v333_v14 }
 0x1b9   :  { %515 = vpow2.f32 %v312_v50 }
 0x1bd   :  { %356 = vperm.xlu1 %507, %v514_v51  }
 0x1bf   :  { %v516_v52 = vpop.eup %515 }
 0x1c0   :  { %351 = vperm.xlu0 %508, %v516_v52   ;;  %v334_v11 = vmul.f32 %v516_v52, %v332_v10 }
 0x21f   :  { %v324_v62 = vpop.permute.xlu1 %323 }
 0x220   :  { %v327_v63 = vsub.f32 %v295_v33, %v324_v62 }
 0x222   :  { %v330_v0 = vmul.f32 1.442695, %v327_v63 }
 0x224   :  { %517 = vpow2.f32 %v330_v0 }
 0x227   :  { %v319_v1 = vpop.permute.xlu1 %318 }
 0x228   :  { %v326_v2 = vsub.f32 %v282_v35, %v319_v1 }
 0x22a   :  { %v518_v3 = vpop.eup %517  ;;  %v328_v4 = vmul.f32 1.442695, %v326_v2 }
 0x22b   :  { %v362_v5 = vpack.c.bf16 %v518_v3, %v518_v3  ;;  %v339_v9 = vsel %vm301_vm2, %v518_v3, 0.0 }
 0x22c   :  { %519 = vpow2.f32 %v328_v4 }
 0x22d   :  { %481 = vmatmul.msk.bf16.vlgmr.msrb.gmra.mxu2 %vm301_vm2, %v362_v5 }
 0x22f   :  { %v357_v31 = vpop.permute.xlu1 %356 }
 0x230   :  { %v360_v32 = vmul.f32 0.0, %v357_v31 }
 0x232   :  { %v520_v6 = vpop.eup %519  ;;  %v352_v26 = vpop.permute.xlu0 %351 }
 0x233   :  { %v336_v7 = vsel %vm301_vm2, %v520_v6, 0.0  ;;  %v361_v8 = vpack.c.bf16 %v520_v6, %v520_v6  ;;  %v359_v27 = vmul.f32 0.0, %v352_v26 }
 0x234   :  { %337 = vadd.xlane.f32.xlu2 %v336_v7 }
 0x235   :  { %480 = vmatmul.msk.bf16.vlgmr.msrb.gmra.mxu1 %vm301_vm2, %v361_v8 }
 0x23c   :  { %340 = vadd.xlane.f32.xlu2 %v339_v9 }
 0x2a7   :  { %v338_v12 = vpop.xlane.xlu2 %337 }
 0x2a8   :  { %v342_v13 = vadd.f32 %v338_v12, %v334_v11 }
 0x2aa   :  { %345 = vst.msk [vmem:[#allocation4] sm:$0xff] %vm179_vm1, %v342_v13 }
 0x2af   :  { %v341_v16 = vpop.xlane.xlu2 %340 }
 0x2b0   :  { %v343_v17 = vadd.f32 %v341_v16, %v335_v15  ;;  %v398_v18 = vpop.f32.mrf.mxu2 }
 0x2b1   :  { %v413_v19 = vld [vmem:[#allocation4] sm:$0xff]  ;;  %v403_v33 = vadd.f32 %v398_v18, %v360_v32 }
 0x2b2   :  { %346 = vst.msk [vmem:[#allocation4 + $0x8] sm:$0xff] %vm179_vm1, %v343_v17  ;;  %v379_v20 = vpop.f32.mrf.mxu1  ;;  %521 = vrcp.f32 %v413_v19 }
 0x2b3   :  { %v402_v28 = vadd.f32 %v379_v20, %v359_v27 }
 0x2b8   :  { %v522_v21 = vpop.eup %521  ;;  %v400_v22 = vpop.f32.mrf.mxu2 }
 0x2b9   :  { %419 = vperm.xlu2 %509, %v522_v21   ;;  %v414_v23 = vld [vmem:[#allocation4 + $0x8] sm:$0xff] }
 0x2ba   :  { %v381_v24 = vpop.f32.mrf.mxu1  ;;  %523 = vrcp.f32 %v414_v23 }
 0x2c0   :  { %v524_v25 = vpop.eup %523 }
 0x2c1   :  { %424 = vperm.xlu1 %507, %v524_v25  }
 0x313   :  { %v420_v29 = vpop.permute.xlu2 %419 }
 0x314   :  { %v427_v30 = vmul.f32 %v420_v29, %v402_v28 }
 0x316   :  { %429 = vst [vmem:[#allocation17] sm:$0xff] %v427_v30 }
 0x333   :  { %v425_v34 = vpop.permute.xlu1 %424 }
 0x334   :  { %v428_v35 = vmul.f32 %v425_v34, %v403_v33 }
 0x336   :  { %430 = vst [vmem:[#allocation17 + $0x8] sm:$0xff] %v428_v35 }
 0x337   :  { %443 = dma.vmem_to_hbm [thread:$0]  %s436_s1, 256, %s438_s24, [#allocation8], %s704_s17, %s704_s17, %s705_s18  }
 0x338   :  { %701 = dma.done.wait [#allocation8], 256  }
 0x339   :  { %702 = vsyncadd [#allocation8], 4294967040 }
 0x33a   :  { %448 = vsyncpa [#allocation7], 1 }
 0x33b   :  { %449 = vsyncpa [#allocation10], 1 }
 0x33c   :  { %450 = vsyncpa [#allocation13], 1 }
 0x33d   :  { %451 = vsyncpa [#allocation16], 1 }
 0x33e   :  { %452 = vsyncpa [#allocation8], 1 }

</bundles_post_ra>
